<compile_context>
chip_gen: v7x
topology: tpu7x:2x2x1
jax: 0.10.0
libtpu: 0.0.40
codegen_flags: <defaults>
</compile_context>

<pallas_src>
import jax
import jax.numpy as jnp
from jax.experimental import pallas as pl
from jax.experimental.pallas import tpu as pltpu

IN_FEATURES = 30 * 30   # 900
HIDDEN = 512
OUT = 10
OUT_PAD = 128           # lane-dense output width
NEG_FILL = -1e30        # plain Python float (baked into padded b2, NOT captured in-kernel)


def _round_up(x, m):
    return ((x + m - 1) // m) * m


def mlp1_kernel(x_ref, w1_ref, b1_ref, w2_ref, b2_ref, o_ref):
    # x_ref:  (TILE_B, 900) f32   ; w1_ref: (900, 512) bf16
    # b1_ref: (1, 512) f32        ; w2_ref: (512, 128) bf16 (cols 10.. are zero)
    # b2_ref: (1, 128) f32 (cols 10.. are -1e30) ; o_ref: (TILE_B, 128) f32
    x = x_ref[...].astype(jnp.bfloat16)                       # cast in-kernel (no HBM prepass)
    h = jnp.dot(x, w1_ref[...],
                preferred_element_type=jnp.float32)           # (TILE_B, 512) f32
    h = jnp.maximum(h + b1_ref[...], 0.0)                     # bias + ReLU in f32

    logits = jnp.dot(h.astype(jnp.bfloat16), w2_ref[...],
                     preferred_element_type=jnp.float32) + b2_ref[...]  # (TILE_B, 128) f32
    # Padded columns: 0 (zero W2 cols) + (-1e30) bias -> never win the max, exp underflows to 0.

    # Numerically stable log-softmax over the last axis.
    m = jnp.max(logits, axis=-1, keepdims=True)
    shifted = logits - m
    lse = jnp.log(jnp.sum(jnp.exp(shifted), axis=-1, keepdims=True))
    o_ref[...] = (shifted - lse).astype(o_ref.dtype)


def mlp1_forward(x, w1, b1, w2, b2, *, tile_b=512):
    """x: (B, 30, 30) float32 -> log-probs (B, 10) float32.

    w1: (900, 512), b1: (512,), w2: (512, 10), b2: (10,)  (x @ W + b layout,
    equivalent to PyTorch's (out,in) weights transposed).
    """
    B = x.shape[0]
    x2 = x.reshape(B, IN_FEATURES).astype(jnp.float32)        # Flatten() — metadata only

    # Batch tile: multiple of 16; capped at ceil(B/2) (rounded up) so v7x gets >=2
    # grid steps whenever B is large enough to split across both TensorCores.
    tb = min(tile_b, max(16, _round_up((B + 1) // 2, 16)))
    tb = _round_up(tb, 16)
    b_pad = _round_up(B, tb)
    if b_pad != B:
        x2 = jnp.pad(x2, ((0, b_pad - B), (0, 0)))            # only when B % tb != 0

    # --- weights / biases: bf16 MXU operands, f32 biases ---
    w1_bf = w1.astype(jnp.bfloat16)                           # (900, 512)
    w2_p = jnp.pad(w2, ((0, 0), (0, OUT_PAD - OUT)))          # zero-padded cols
    w2_bf = w2_p.astype(jnp.bfloat16)                         # (512, 128)
    b1_2d = b1.reshape(1, HIDDEN).astype(jnp.float32)
    b2_p = jnp.pad(b2.astype(jnp.float32), (0, OUT_PAD - OUT),
                   constant_values=NEG_FILL)                  # pad cols get -1e30
    b2_2d = b2_p.reshape(1, OUT_PAD)

    grid = (b_pad // tb,)

    out = pl.pallas_call(
        mlp1_kernel,
        out_shape=jax.ShapeDtypeStruct((b_pad, OUT_PAD), jnp.float32),
        grid=grid,
        in_specs=[
            # x: f32, tiled over the batch; last block dim == full array dim (900).
            pl.BlockSpec((tb, IN_FEATURES), lambda i: (i, 0)),
            # weights / biases: constant index_map -> resident in VMEM for all steps
            pl.BlockSpec((IN_FEATURES, HIDDEN), lambda i: (0, 0)),
            pl.BlockSpec((1, HIDDEN), lambda i: (0, 0)),
            pl.BlockSpec((HIDDEN, OUT_PAD), lambda i: (0, 0)),
            pl.BlockSpec((1, OUT_PAD), lambda i: (0, 0)),
        ],
        out_specs=pl.BlockSpec((tb, OUT_PAD), lambda i: (i, 0)),
        compiler_params=pltpu.CompilerParams(
            dimension_semantics=("parallel",),
        ),
    )(x2, w1_bf, b1_2d, w2_bf, b2_2d)

    # Strip batch padding and the lane padding of the output.
    return out[:B, :OUT]


def init_params(key):
    """Deterministic init mimicking PyTorch Linear default (uniform ±1/sqrt(fan_in))."""
    k1, k2, k3, k4 = jax.random.split(key, 4)
    bound1 = 1.0 / jnp.sqrt(IN_FEATURES)
    bound2 = 1.0 / jnp.sqrt(HIDDEN)
    w1 = jax.random.uniform(k1, (IN_FEATURES, HIDDEN), jnp.float32, -bound1, bound1)
    b1 = jax.random.uniform(k2, (HIDDEN,), jnp.float32, -bound1, bound1)
    w2 = jax.random.uniform(k3, (HIDDEN, OUT), jnp.float32, -bound2, bound2)
    b2 = jax.random.uniform(k4, (OUT,), jnp.float32, -bound2, bound2)
    return w1, b1, w2, b2


if __name__ == "__main__":
    key = jax.random.PRNGKey(0)
    k_x, k_p = jax.random.split(key)
    B = 2
    x = jax.random.normal(k_x, (B, 30, 30), jnp.float32)
    w1, b1, w2, b2 = init_params(k_p)

    out = mlp1_forward(x, w1, b1, w2, b2)
    out = jax.block_until_ready(out)

    # Sanity check against plain-JAX f32 reference (bf16 MXU operands -> loosened tol).
    x_flat = x.reshape(B, IN_FEATURES)
    h_ref = jnp.maximum(x_flat @ w1 + b1, 0.0)
    logits_ref = h_ref @ w2 + b2
    ref = jax.nn.log_softmax(logits_ref, axis=1)

    assert out.shape == (B, OUT)
    assert bool(jnp.all(jnp.isfinite(out)))
    assert jnp.allclose(out, ref, atol=5e-2, rtol=0.0), (
        f"max abs err = {jnp.max(jnp.abs(out - ref))}")

    print("KERNEL_OK")
</pallas_src>

<mosaic_0001>
module attributes {stable_mosaic.version = 11 : i64} {
  func.func @mlp1_kernel(%arg0: i32, %arg1: memref<16x900xf32, #tpu.memory_space<vmem>>, %arg2: memref<900x512xbf16, #tpu.memory_space<vmem>>, %arg3: memref<1x512xf32, #tpu.memory_space<vmem>>, %arg4: memref<512x128xbf16, #tpu.memory_space<vmem>>, %arg5: memref<1x128xf32, #tpu.memory_space<vmem>>, %arg6: memref<16x128xf32, #tpu.memory_space<vmem>>) attributes {dimension_semantics = [#tpu.dimension_semantics<parallel>], iteration_bounds = array<i64: 1>, scalar_prefetch = 0 : i64, scratch_operands = 0 : i64, tpu.core_type = #tpu.core_type<tc>, window_params = [{transform_indices = @transform_0, window_bounds = array<i64: 16, 900>}, {pipeline_mode = #tpu.pipeline_mode<synchronous>, transform_indices = @transform_1, window_bounds = array<i64: 900, 512>}, {pipeline_mode = #tpu.pipeline_mode<synchronous>, transform_indices = @transform_2, window_bounds = array<i64: 1, 512>}, {pipeline_mode = #tpu.pipeline_mode<synchronous>, transform_indices = @transform_3, window_bounds = array<i64: 512, 128>}, {pipeline_mode = #tpu.pipeline_mode<synchronous>, transform_indices = @transform_4, window_bounds = array<i64: 1, 128>}, {transform_indices = @transform_5, window_bounds = array<i64: 16, 128>}]} {
    %c0 = arith.constant 0 : index
    %c0_0 = arith.constant 0 : index
    %0 = vector.load %arg1[%c0, %c0_0] : memref<16x900xf32, #tpu.memory_space<vmem>>, vector<16x900xf32>
    %1 = arith.truncf %0 : vector<16x900xf32> to vector<16x900xbf16>
    %c0_1 = arith.constant 0 : index
    %c0_2 = arith.constant 0 : index
    %2 = vector.load %arg2[%c0_1, %c0_2] : memref<900x512xbf16, #tpu.memory_space<vmem>>, vector<900x512xbf16>
    %cst = arith.constant dense<0.000000e+00> : vector<16x512xf32>
    %3 = tpu.matmul %1, %2, %cst {dimension_numbers = #tpu.dot_dimension_numbers<[1], [0], [0], [1], [0, 0, 1, 1], [], []>} : vector<16x900xbf16>, vector<900x512xbf16>, vector<16x512xf32> -> vector<16x512xf32>
    %c0_3 = arith.constant 0 : index
    %c0_4 = arith.constant 0 : index
    %4 = vector.load %arg3[%c0_3, %c0_4] : memref<1x512xf32, #tpu.memory_space<vmem>>, vector<1x512xf32>
    %5 = vector.broadcast %4 : vector<1x512xf32> to vector<16x512xf32>
    %6 = arith.addf %3, %5 : vector<16x512xf32>
    %cst_5 = arith.constant 0.000000e+00 : f32
    %7 = vector.broadcast %cst_5 : f32 to vector<16x512xf32>
    %8 = arith.maximumf %6, %7 : vector<16x512xf32>
    %9 = arith.truncf %8 : vector<16x512xf32> to vector<16x512xbf16>
    %c0_6 = arith.constant 0 : index
    %c0_7 = arith.constant 0 : index
    %10 = vector.load %arg4[%c0_6, %c0_7] : memref<512x128xbf16, #tpu.memory_space<vmem>>, vector<512x128xbf16>
    %cst_8 = arith.constant dense<0.000000e+00> : vector<16x128xf32>
    %11 = tpu.matmul %9, %10, %cst_8 {dimension_numbers = #tpu.dot_dimension_numbers<[1], [0], [0], [1], [0, 0, 1, 1], [], []>} : vector<16x512xbf16>, vector<512x128xbf16>, vector<16x128xf32> -> vector<16x128xf32>
    %c0_9 = arith.constant 0 : index
    %c0_10 = arith.constant 0 : index
    %12 = vector.load %arg5[%c0_9, %c0_10] : memref<1x128xf32, #tpu.memory_space<vmem>>, vector<1x128xf32>
    %13 = vector.broadcast %12 : vector<1x128xf32> to vector<16x128xf32>
    %14 = arith.addf %11, %13 : vector<16x128xf32>
    %cst_11 = arith.constant dense<0xFF800000> : vector<16xf32>
    %15 = vector.multi_reduction <maximumf>, %14, %cst_11 [1] : vector<16x128xf32> to vector<16xf32>
    %16 = vector.shape_cast %15 : vector<16xf32> to vector<16x1xf32>
    %17 = vector.broadcast %16 : vector<16x1xf32> to vector<16x128xf32>
    %18 = arith.subf %14, %17 : vector<16x128xf32>
    %19 = math.exp %18 : vector<16x128xf32>
    %cst_12 = arith.constant dense<0.000000e+00> : vector<16xf32>
    %20 = vector.multi_reduction <add>, %19, %cst_12 [1] : vector<16x128xf32> to vector<16xf32>
    %21 = vector.shape_cast %20 : vector<16xf32> to vector<16x1xf32>
    %22 = math.log %21 : vector<16x1xf32>
    %23 = vector.broadcast %22 : vector<16x1xf32> to vector<16x128xf32>
    %24 = arith.subf %18, %23 : vector<16x128xf32>
    %c0_13 = arith.constant 0 : index
    %c0_14 = arith.constant 0 : index
    %25 = vector.load %arg6[%c0_13, %c0_14] : memref<16x128xf32, #tpu.memory_space<vmem>>, vector<16x128xf32>
    tpu.vector_store %arg6[%c0_13, %c0_14], %24 {strides = array<i32>} : memref<16x128xf32, #tpu.memory_space<vmem>>, vector<16x128xf32>,
    return
  }
  func.func @transform_0(%arg0: i32) -> (i32, i32) {
    %c0_i32 = arith.constant 0 : i32
    %c0_i32_0 = arith.constant 0 : i32
    return %arg0, %c0_i32 : i32, i32
  }
  func.func @transform_1(%arg0: i32) -> (i32, i32) {
    %c0_i32 = arith.constant 0 : i32
    %c0_i32_0 = arith.constant 0 : i32
    %c0_i32_1 = arith.constant 0 : i32
    return %c0_i32, %c0_i32_0 : i32, i32
  }
  func.func @transform_2(%arg0: i32) -> (i32, i32) {
    %c0_i32 = arith.constant 0 : i32
    %c0_i32_0 = arith.constant 0 : i32
    %c0_i32_1 = arith.constant 0 : i32
    return %c0_i32, %c0_i32_0 : i32, i32
  }
  func.func @transform_3(%arg0: i32) -> (i32, i32) {
    %c0_i32 = arith.constant 0 : i32
    %c0_i32_0 = arith.constant 0 : i32
    %c0_i32_1 = arith.constant 0 : i32
    return %c0_i32, %c0_i32_0 : i32, i32
  }
  func.func @transform_4(%arg0: i32) -> (i32, i32) {
    %c0_i32 = arith.constant 0 : i32
    %c0_i32_0 = arith.constant 0 : i32
    %c0_i32_1 = arith.constant 0 : i32
    return %c0_i32, %c0_i32_0 : i32, i32
  }
  func.func @transform_5(%arg0: i32) -> (i32, i32) {
    %c0_i32 = arith.constant 0 : i32
    %c0_i32_0 = arith.constant 0 : i32
    return %arg0, %c0_i32 : i32, i32
  }
}

</mosaic_0001>

<bundles_post_ra>
// kernel: tpu_custom_call.1
= control target key start
LH: loop header
LB: loop body
LE: loop exit
PB: predicated region body
PF: predicated region fallthrough
CT: control target
= control target key end

     0   :  { %10 = vsyncpa [#allocation3], 0  ;;  %s3144_s0 = inlined_call_operand.hbm [shape: f32[16,900], index: 0, kind: input, shape index: {}]   ;;  %s3145_s1 = inlined_call_operand.hbm [shape: bf16[900,512], index: 1, kind: input, shape index: {}]   ;;  %s3146_s2 = inlined_call_operand.vmem [shape: f32[1,512], index: 2, kind: input, shape index: {}]   ;;  %s3147_s3 = inlined_call_operand.hbm [shape: bf16[512,128], index: 3, kind: input, shape index: {}]   ;;  %s3148_s4 = inlined_call_operand.vmem [shape: f32[1,128], index: 4, kind: input, shape index: {}]   ;;  %s3149_s5 = inlined_call_operand.hbm [shape: f32[16,128], index: 5, kind: output, shape index: {}]  }
   0x1   :  { %11 = vsyncpa [#allocation6], 0 }
   0x2   :  { %12 = vsyncpa [#allocation4], 0  ;;  %s3049_s18 = smov [#allocation5]   ;;  %s2955_s22 = scalar_lea.hbm %s3145_s1, 28928 }
   0x3   :  { %s30_s19 = sshll.u32 %s3049_s18, 4  ;;  %p2956_p0 = scmp.ne.s32.totalorder %s3145_s1, %s2955_s22  ;;  %s31_s19 = int_to_ptr.vmem [resolvable:$true] %s30_s19 }
   0x4   :  { %p2959_p1 = scmp.lt.u32.totalorder %s2955_s22, %s3145_s1 }
   0x6   :  { %p2961_p2 = pnand %p2959_p1, %p2956_p0 }
   0x8   :  { %2964 = shalt.err (!%p2961_p2)
}
   0x9   :  { %s2965_s27 = scalar_lea.vmem %s31_s19, 28928  ;;  %p2970_p4 = scmp.lt.s32.totalorder %s31_s19, %s31_s19 }
   0xa   :  { %p2966_p3 = scmp.ne.s32.totalorder %s31_s19, %s2965_s27  ;;  %p2971_p5 = scmp.lt.s32.totalorder %s2965_s27, %s2965_s27 }
   0xc   :  { %p2972_p6 = por %p2971_p5, %p2970_p4 }
   0xe   :  { %p2973_p7 = pnand %p2972_p6, %p2966_p3 }
  0x10   :  { %2976 = shalt.err (!%p2973_p7)
}
  0x11   :  { %s3050_s28 = smov 256   ;;  %s3051_s29 = smov 16  }
  0x12   :  { %36 = dma.hbm_to_vmem [thread:$0]  %s3145_s1, 28928, %s31_s19, [#allocation6], %s3050_s28, %s3050_s28, %s3051_s29  }
  0x13   :  { %s3052_s7 = smov [#allocation2]   ;;  %s2977_s11 = scalar_lea.hbm %s3144_s0, 2048 }
  0x14   :  { %s18_s8 = sshll.u32 %s3052_s7, 4  ;;  %p2978_p8 = scmp.ne.s32.totalorder %s3144_s0, %s2977_s11  ;;  %s19_s8 = int_to_ptr.vmem [resolvable:$true] %s18_s8 }
  0x15   :  { %p2981_p9 = scmp.lt.u32.totalorder %s2977_s11, %s3144_s0 }
  0x17   :  { %p2983_p10 = pnand %p2981_p9, %p2978_p8 }
  0x19   :  { %2986 = shalt.err (!%p2983_p10)
}
  0x1a   :  { %s2987_s16 = scalar_lea.vmem %s19_s8, 2048  ;;  %p2992_p12 = scmp.lt.s32.totalorder %s19_s8, %s19_s8 }
  0x1b   :  { %p2988_p11 = scmp.ne.s32.totalorder %s19_s8, %s2987_s16  ;;  %p2993_p13 = scmp.lt.s32.totalorder %s2987_s16, %s2987_s16 }
  0x1d   :  { %p2994_p0 = por %p2993_p13, %p2992_p12 }
  0x1f   :  { %p2995_p1 = pnand %p2994_p0, %p2988_p11 }
  0x21   :  { %2998 = shalt.err (!%p2995_p1)
}
  0x22   :  { %s3053_s1 = smov 1024   ;;  %s3054_s17 = smov 64  }
  0x23   :  { %24 = dma.hbm_to_vmem [thread:$0]  %s3144_s0, 2048, %s19_s8, [#allocation3], %s3053_s1, %s3053_s1, %s3054_s17  }
  0x24   :  { %s3055_s20 = smov [#allocation7]   ;;  %s2999_s24 = scalar_lea.hbm %s3147_s3, 4096 }
  0x25   :  { %s44_s21 = sshll.u32 %s3055_s20, 4  ;;  %p3000_p2 = scmp.ne.s32.totalorder %s3147_s3, %s2999_s24  ;;  %s45_s21 = int_to_ptr.vmem [resolvable:$true] %s44_s21 }
  0x26   :  { %p3003_p3 = scmp.lt.u32.totalorder %s2999_s24, %s3147_s3 }
  0x28   :  { %p3005_p4 = pnand %p3003_p3, %p3000_p2 }
  0x2a   :  { %3008 = shalt.err (!%p3005_p4)
}
  0x2b   :  { %s3009_s29 = scalar_lea.vmem %s45_s21, 4096  ;;  %p3014_p6 = scmp.lt.s32.totalorder %s45_s21, %s45_s21 }
  0x2c   :  { %p3010_p5 = scmp.ne.s32.totalorder %s45_s21, %s3009_s29  ;;  %p3015_p7 = scmp.lt.s32.totalorder %s3009_s29, %s3009_s29 }
  0x2e   :  { %p3016_p8 = por %p3015_p7, %p3014_p6 }
  0x30   :  { %p3017_p9 = pnand %p3016_p8, %p3010_p5 }
  0x32   :  { %3020 = shalt.err (!%p3017_p9)
}
  0x33   :  { %s3056_s0 = smov 4  }
  0x34   :  { %50 = dma.hbm_to_vmem [thread:$0]  %s3147_s3, 4096, %s45_s21, [#allocation6], %s3054_s17, %s3054_s17, %s3056_s0  }
  0x35   :  { %3043 = dma.done.wait [#allocation3], 2048  }
  0x36   :  { %3044 = vsyncadd [#allocation3], 4294965248 }
  0x37   :  { %3045 = dma.done.wait [#allocation6], 33024  }
  0x38   :  { %3046 = vsyncadd [#allocation6], 4294934272  ;;  %v2575_v0 = vld [vmem:[#allocation5 + $0x4] ss:$16 sps:$4 sm:$0xff]   ;;  %v2577_v1 = vld [vmem:[#allocation5 + $0xc] ss:$16 sps:$4 sm:$0xff]  }
  0x39   :  { %1482 = vmatprep.subr.bf16.mxu0 %v2575_v0  ;;  %v2579_v2 = vld [vmem:[#allocation5] ss:$16 sps:$4 sm:$0xff]   ;;  %v2580_v3 = vld [vmem:[#allocation5 + $0x8] ss:$16 sps:$4 sm:$0xff]   ;;  %1654 = vmatprep.subr.bf16.mxu1 %v2577_v1  ;;  %v2581_v4 = vld [vmem:[#allocation5 + $0x24] ss:$16 sps:$4 sm:$0xff]  }
  0x3a   :  { %1483 = vmatpush1.bf16.msra.mxu0 %v2579_v2  ;;  %1655 = vmatpush1.bf16.msra.mxu1 %v2580_v3  ;;  %v2583_v5 = vld [vmem:[#allocation5 + $0x2c] ss:$16 sps:$4 sm:$0xff]   ;;  %v2585_v6 = vld [vmem:[#allocation5 + $0x20] ss:$16 sps:$4 sm:$0xff]   ;;  %v2586_v7 = vld [vmem:[#allocation5 + $0x28] ss:$16 sps:$4 sm:$0xff]  }
  0x3b   :  { %1484 = vmatprep.subr.bf16.mxu0 %v2581_v4  ;;  %1656 = vmatprep.subr.bf16.mxu1 %v2583_v5  ;;  %v2587_v8 = vld [vmem:[#allocation5 + $0x44] ss:$16 sps:$4 sm:$0xff]   ;;  %v2589_v9 = vld [vmem:[#allocation5 + $0x4c] ss:$16 sps:$4 sm:$0xff]   ;;  %v2591_v10 = vld [vmem:[#allocation5 + $0x40] ss:$16 sps:$4 sm:$0xff]  }
  0x3c   :  { %v2592_v11 = vld [vmem:[#allocation5 + $0x48] ss:$16 sps:$4 sm:$0xff]   ;;  %v2593_v12 = vld [vmem:[#allocation5 + $0x64] ss:$16 sps:$4 sm:$0xff]   ;;  %v2595_v13 = vld [vmem:[#allocation5 + $0x6c] ss:$16 sps:$4 sm:$0xff]  }
  0x3d   :  { %v2597_v14 = vld [vmem:[#allocation5 + $0x60] ss:$16 sps:$4 sm:$0xff]   ;;  %v2598_v15 = vld [vmem:[#allocation5 + $0x68] ss:$16 sps:$4 sm:$0xff]   ;;  %v2599_v16 = vld [vmem:[#allocation5 + $0x84] ss:$16 sps:$4 sm:$0xff]  }
  0x3e   :  { %1485 = vmatpush1.bf16.msra.mxu0 %v2585_v6  ;;  %1657 = vmatpush1.bf16.msra.mxu1 %v2586_v7  ;;  %v2601_v17 = vld [vmem:[#allocation5 + $0x8c] ss:$16 sps:$4 sm:$0xff]   ;;  %v2603_v18 = vld [vmem:[#allocation5 + $0x80] ss:$16 sps:$4 sm:$0xff]   ;;  %v2604_v19 = vld [vmem:[#allocation5 + $0x88] ss:$16 sps:$4 sm:$0xff]  }
  0x3f   :  { %1486 = vmatprep.subr.bf16.mxu0 %v2587_v8  ;;  %1658 = vmatprep.subr.bf16.mxu1 %v2589_v9  ;;  %v2605_v20 = vld [vmem:[#allocation5 + $0xa4] ss:$16 sps:$4 sm:$0xff]   ;;  %v2607_v21 = vld [vmem:[#allocation5 + $0xac] ss:$16 sps:$4 sm:$0xff]   ;;  %v2609_v22 = vld [vmem:[#allocation5 + $0xa0] ss:$16 sps:$4 sm:$0xff]  }
  0x40   :  { %v2610_v23 = vld [vmem:[#allocation5 + $0xa8] ss:$16 sps:$4 sm:$0xff]   ;;  %v2611_v24 = vld [vmem:[#allocation5 + $0xc4] ss:$16 sps:$4 sm:$0xff]   ;;  %v2613_v25 = vld [vmem:[#allocation5 + $0xcc] ss:$16 sps:$4 sm:$0xff]  }
  0x41   :  { %v2615_v26 = vld [vmem:[#allocation5 + $0xc0] ss:$16 sps:$4 sm:$0xff]   ;;  %v2616_v27 = vld [vmem:[#allocation5 + $0xc8] ss:$16 sps:$4 sm:$0xff]   ;;  %v2617_v28 = vld [vmem:[#allocation5 + $0xe4] ss:$16 sps:$4 sm:$0xff]  }
  0x42   :  { %1487 = vmatpush1.bf16.msra.mxu0 %v2591_v10  ;;  %1659 = vmatpush1.bf16.msra.mxu1 %v2592_v11  ;;  %v2619_v29 = vld [vmem:[#allocation5 + $0xec] ss:$16 sps:$4 sm:$0xff]   ;;  %v2621_v30 = vld [vmem:[#allocation5 + $0xe0] ss:$16 sps:$4 sm:$0xff]   ;;  %v2622_v31 = vld [vmem:[#allocation5 + $0xe8] ss:$16 sps:$4 sm:$0xff]  }
  0x43   :  { %1488 = vmatprep.subr.bf16.mxu0 %v2593_v12  ;;  %1660 = vmatprep.subr.bf16.mxu1 %v2595_v13  ;;  %v2623_v32 = vld [vmem:[#allocation5 + $0x104] ss:$16 sps:$4 sm:$0xff]   ;;  %v2625_v33 = vld [vmem:[#allocation5 + $0x10c] ss:$16 sps:$4 sm:$0xff]   ;;  %v2627_v34 = vld [vmem:[#allocation5 + $0x100] ss:$16 sps:$4 sm:$0xff]  }
  0x44   :  { %v2628_v35 = vld [vmem:[#allocation5 + $0x108] ss:$16 sps:$4 sm:$0xff]   ;;  %v2629_v36 = vld [vmem:[#allocation5 + $0x124] ss:$16 sps:$4 sm:$0xff]   ;;  %v2631_v37 = vld [vmem:[#allocation5 + $0x12c] ss:$16 sps:$4 sm:$0xff]  }
  0x45   :  { %v2633_v38 = vld [vmem:[#allocation5 + $0x120] ss:$16 sps:$4 sm:$0xff]   ;;  %v2634_v39 = vld [vmem:[#allocation5 + $0x128] ss:$16 sps:$4 sm:$0xff]   ;;  %v2635_v40 = vld [vmem:[#allocation5 + $0x144] ss:$16 sps:$4 sm:$0xff]  }
  0x46   :  { %1489 = vmatpush1.bf16.msra.mxu0 %v2597_v14  ;;  %1661 = vmatpush1.bf16.msra.mxu1 %v2598_v15  ;;  %v2637_v41 = vld [vmem:[#allocation5 + $0x14c] ss:$16 sps:$4 sm:$0xff]   ;;  %v2639_v42 = vld [vmem:[#allocation5 + $0x140] ss:$16 sps:$4 sm:$0xff]   ;;  %v2640_v43 = vld [vmem:[#allocation5 + $0x148] ss:$16 sps:$4 sm:$0xff]  }
  0x47   :  { %1490 = vmatprep.subr.bf16.mxu0 %v2599_v16  ;;  %1662 = vmatprep.subr.bf16.mxu1 %v2601_v17  ;;  %v2641_v44 = vld [vmem:[#allocation5 + $0x164] ss:$16 sps:$4 sm:$0xff]   ;;  %v2643_v45 = vld [vmem:[#allocation5 + $0x16c] ss:$16 sps:$4 sm:$0xff]   ;;  %v2645_v48 = vld [vmem:[#allocation5 + $0x160] ss:$16 sps:$4 sm:$0xff]  }
  0x48   :  { %v64_v46 = vld [vmem:[#allocation2 + $0x8] sm:$0xff]  ;;  %v2647_v51 = vld [vmem:[#allocation5 + $0x184] ss:$16 sps:$4 sm:$0xff]   ;;  %v2651_v53 = vld [vmem:[#allocation5 + $0x180] ss:$16 sps:$4 sm:$0xff]   ;;  %vm1465_vm0 = vcmask 31744  }
  0x49   :  { %v72_v47 = vld [vmem:[#allocation2 + $0x48] sm:$0xff]  ;;  %v2653_v55 = vld [vmem:[#allocation5 + $0x1a4] ss:$16 sps:$4 sm:$0xff]   ;;  %v2657_v57 = vld [vmem:[#allocation5 + $0x1a0] ss:$16 sps:$4 sm:$0xff]   ;;  %vm1469_vm1 = vcmask 1041408  }
  0x4a   :  { %1491 = vmatpush1.bf16.msra.mxu0 %v2603_v18  ;;  %1663 = vmatpush1.bf16.msra.mxu1 %v2604_v19  ;;  %v2646_v49 = vld [vmem:[#allocation5 + $0x168] ss:$16 sps:$4 sm:$0xff]   ;;  %v80_v50 = vpack.c.bf16 %v72_v47, %v64_v46  ;;  %v2649_v52 = vld [vmem:[#allocation5 + $0x18c] ss:$16 sps:$4 sm:$0xff]   ;;  %v2659_v59 = vld [vmem:[#allocation5 + $0x1c4] ss:$16 sps:$4 sm:$0xff]  }
  0x4b   :  { %1492 = vmatprep.subr.bf16.mxu0 %v2605_v20  ;;  %1664 = vmatprep.subr.bf16.mxu1 %v2607_v21  ;;  %v2652_v54 = vld [vmem:[#allocation5 + $0x188] ss:$16 sps:$4 sm:$0xff]   ;;  %v2655_v56 = vld [vmem:[#allocation5 + $0x1ac] ss:$16 sps:$4 sm:$0xff]   ;;  %v2663_v61 = vld [vmem:[#allocation5 + $0x1c0] ss:$16 sps:$4 sm:$0xff]  }
  0x4c   :  { %1514 = vmatprep.mubr.bf16.mxu0 %v80_v50  ;;  %1686 = vmatprep.mubr.bf16.mxu1 %v80_v50  ;;  %v2658_v58 = vld [vmem:[#allocation5 + $0x1a8] ss:$16 sps:$4 sm:$0xff]   ;;  %v2661_v60 = vld [vmem:[#allocation5 + $0x1cc] ss:$16 sps:$4 sm:$0xff]   ;;  %v2665_v63 = vld [vmem:[#allocation5 + $0x1e4] ss:$16 sps:$4 sm:$0xff]  }
  0x4d   :  { %v2664_v62 = vld [vmem:[#allocation5 + $0x1c8] ss:$16 sps:$4 sm:$0xff]   ;;  %v2667_v0 = vld [vmem:[#allocation5 + $0x1ec] ss:$16 sps:$4 sm:$0xff]   ;;  %v2669_v1 = vld [vmem:[#allocation5 + $0x1e0] ss:$16 sps:$4 sm:$0xff]  }
  0x4e   :  { %1493 = vmatpush1.bf16.msra.mxu0 %v2609_v22  ;;  %1665 = vmatpush1.bf16.msra.mxu1 %v2610_v23  ;;  %v2670_v2 = vld [vmem:[#allocation5 + $0x1e8] ss:$16 sps:$4 sm:$0xff]   ;;  %v2673_v3 = vld [vmem:[#allocation5 + $0x204] ss:$16 sps:$4 sm:$0xff]   ;;  %v2676_v6 = vld [vmem:[#allocation5 + $0x20c] ss:$16 sps:$4 sm:$0xff]  }
  0x4f   :  { %1494 = vmatprep.subr.bf16.mxu0 %v2611_v24  ;;  %1666 = vmatprep.subr.bf16.mxu1 %v2613_v25  ;;  %v63_v4 = vld [vmem:[#allocation2] sm:$0xff]  ;;  %v2674_v8 = vld [vmem:[#allocation5 + $0x208] ss:$16 sps:$4 sm:$0xff]   ;;  %v2682_v11 = vld [vmem:[#allocation5 + $0x22c] ss:$16 sps:$4 sm:$0xff]  }
  0x50   :  { %v71_v5 = vld [vmem:[#allocation2 + $0x40] sm:$0xff]  ;;  %v2680_v13 = vld [vmem:[#allocation5 + $0x228] ss:$16 sps:$4 sm:$0xff]   ;;  %v2688_v15 = vld [vmem:[#allocation5 + $0x24c] ss:$16 sps:$4 sm:$0xff]  }
  0x51   :  { %v2671_v7 = vld [vmem:[#allocation5 + $0x200] ss:$16 sps:$4 sm:$0xff]   ;;  %v79_v9 = vpack.c.bf16 %v71_v5, %v63_v4  ;;  %v2679_v10 = vld [vmem:[#allocation5 + $0x224] ss:$16 sps:$4 sm:$0xff]   ;;  %v2686_v17 = vld [vmem:[#allocation5 + $0x248] ss:$16 sps:$4 sm:$0xff]  }
  0x52   :  { %1495 = vmatpush1.bf16.msra.mxu0 %v2615_v26  ;;  %1667 = vmatpush1.bf16.msra.mxu1 %v2616_v27  ;;  %v2677_v12 = vld [vmem:[#allocation5 + $0x220] ss:$16 sps:$4 sm:$0xff]   ;;  %v2685_v14 = vld [vmem:[#allocation5 + $0x244] ss:$16 sps:$4 sm:$0xff]   ;;  %v2694_v19 = vld [vmem:[#allocation5 + $0x26c] ss:$16 sps:$4 sm:$0xff]  }
  0x53   :  { %1496 = vmatprep.subr.bf16.mxu0 %v2617_v28  ;;  %1668 = vmatprep.subr.bf16.mxu1 %v2619_v29  ;;  %v2683_v16 = vld [vmem:[#allocation5 + $0x240] ss:$16 sps:$4 sm:$0xff]   ;;  %v2691_v18 = vld [vmem:[#allocation5 + $0x264] ss:$16 sps:$4 sm:$0xff]   ;;  %v2692_v21 = vld [vmem:[#allocation5 + $0x268] ss:$16 sps:$4 sm:$0xff]  }
  0x54   :  { %v2689_v20 = vld [vmem:[#allocation5 + $0x260] ss:$16 sps:$4 sm:$0xff]   ;;  %v2697_v22 = vld [vmem:[#allocation5 + $0x284] ss:$16 sps:$4 sm:$0xff]   ;;  %v2700_v23 = vld [vmem:[#allocation5 + $0x28c] ss:$16 sps:$4 sm:$0xff]  }
  0x55   :  { %v2695_v24 = vld [vmem:[#allocation5 + $0x280] ss:$16 sps:$4 sm:$0xff]   ;;  %v2698_v25 = vld [vmem:[#allocation5 + $0x288] ss:$16 sps:$4 sm:$0xff]   ;;  %v2703_v26 = vld [vmem:[#allocation5 + $0x2a4] ss:$16 sps:$4 sm:$0xff]  }
  0x56   :  { %1497 = vmatpush1.bf16.msra.mxu0 %v2621_v30  ;;  %1669 = vmatpush1.bf16.msra.mxu1 %v2622_v31  ;;  %v2706_v27 = vld [vmem:[#allocation5 + $0x2ac] ss:$16 sps:$4 sm:$0xff]   ;;  %v2701_v28 = vld [vmem:[#allocation5 + $0x2a0] ss:$16 sps:$4 sm:$0xff]   ;;  %v2704_v29 = vld [vmem:[#allocation5 + $0x2a8] ss:$16 sps:$4 sm:$0xff]  }
  0x57   :  { %1498 = vmatprep.subr.bf16.mxu0 %v2623_v32  ;;  %1670 = vmatprep.subr.bf16.mxu1 %v2625_v33  ;;  %v2709_v30 = vld [vmem:[#allocation5 + $0x2c4] ss:$16 sps:$4 sm:$0xff]   ;;  %v2712_v31 = vld [vmem:[#allocation5 + $0x2cc] ss:$16 sps:$4 sm:$0xff]   ;;  %v2725_v47 = vld [vmem:[#allocation5 + $0x320] ss:$16 sps:$4 sm:$0xff]  }
  0x58   :  { %v66_v32 = vld [vmem:[#allocation2 + $0x18] sm:$0xff]  ;;  %v2763_v5 = vld [vmem:[#allocation5 + $0x3e4] ss:$16 sps:$4 sm:$0xff]  }
  0x59   :  { %v74_v33 = vld [vmem:[#allocation2 + $0x58] sm:$0xff] }
  0x5a   :  { %1499 = vmatpush1.bf16.msra.mxu0 %v2627_v34  ;;  %1671 = vmatpush1.bf16.msra.mxu1 %v2628_v35  ;;  %v2707_v34 = vld [vmem:[#allocation5 + $0x2c0] ss:$16 sps:$4 sm:$0xff]   ;;  %v2710_v35 = vld [vmem:[#allocation5 + $0x2c8] ss:$16 sps:$4 sm:$0xff]   ;;  %v2730_v46 = vld [vmem:[#allocation5 + $0x32c] ss:$16 sps:$4 sm:$0xff]  }
  0x5b   :  { %1500 = vmatprep.subr.bf16.mxu0 %v2629_v36  ;;  %1672 = vmatprep.subr.bf16.mxu1 %v2631_v37  ;;  %v82_v36 = vpack.c.bf16 %v74_v33, %v66_v32  ;;  %v2715_v37 = vld [vmem:[#allocation5 + $0x2e4] ss:$16 sps:$4 sm:$0xff]   ;;  %v2736_v50 = vld [vmem:[#allocation5 + $0x34c] ss:$16 sps:$4 sm:$0xff]   ;;  %v2758_v4 = vld [vmem:[#allocation5 + $0x3c8] ss:$16 sps:$4 sm:$0xff]  }
  0x5c   :  { %v2796_v32 = vld [vmem:[#allocation5 + $0x48c] ss:$16 sps:$4 sm:$0xff]   ;;  %v2791_v33 = vld [vmem:[#allocation5 + $0x480] ss:$16 sps:$4 sm:$0xff]  }
  0x5e   :  { %1501 = vmatpush1.bf16.msra.mxu0 %v2633_v38  ;;  %1673 = vmatpush1.bf16.msra.mxu1 %v2634_v39  ;;  %v2718_v38 = vld [vmem:[#allocation5 + $0x2ec] ss:$16 sps:$4 sm:$0xff]   ;;  %v2713_v39 = vld [vmem:[#allocation5 + $0x2e0] ss:$16 sps:$4 sm:$0xff]  }
  0x5f   :  { %1502 = vmatprep.subr.bf16.mxu0 %v2635_v40  ;;  %1674 = vmatprep.subr.bf16.mxu1 %v2637_v41  ;;  %v2716_v40 = vld [vmem:[#allocation5 + $0x2e8] ss:$16 sps:$4 sm:$0xff]   ;;  %v2721_v41 = vld [vmem:[#allocation5 + $0x304] ss:$16 sps:$4 sm:$0xff]  }
  0x62   :  { %1503 = vmatpush1.bf16.msra.mxu0 %v2639_v42  ;;  %1675 = vmatpush1.bf16.msra.mxu1 %v2640_v43  ;;  %v2724_v42 = vld [vmem:[#allocation5 + $0x30c] ss:$16 sps:$4 sm:$0xff]   ;;  %v2719_v43 = vld [vmem:[#allocation5 + $0x300] ss:$16 sps:$4 sm:$0xff]  }
  0x63   :  { %1504 = vmatprep.subr.bf16.mxu0 %v2641_v44  ;;  %1676 = vmatprep.subr.bf16.mxu1 %v2643_v45  ;;  %v2722_v44 = vld [vmem:[#allocation5 + $0x308] ss:$16 sps:$4 sm:$0xff]   ;;  %v2727_v45 = vld [vmem:[#allocation5 + $0x324] ss:$16 sps:$4 sm:$0xff]  }
  0x66   :  { %1505 = vmatpush1.bf16.msra.mxu0 %v2645_v48  ;;  %1677 = vmatpush1.bf16.msra.mxu1 %v2646_v49  ;;  %v2728_v48 = vld [vmem:[#allocation5 + $0x328] ss:$16 sps:$4 sm:$0xff]   ;;  %v2733_v49 = vld [vmem:[#allocation5 + $0x344] ss:$16 sps:$4 sm:$0xff]  }
  0x67   :  { %1506 = vmatprep.subr.bf16.mxu0 %v2647_v51  ;;  %1678 = vmatprep.subr.bf16.mxu1 %v2649_v52  ;;  %v2731_v51 = vld [vmem:[#allocation5 + $0x340] ss:$16 sps:$4 sm:$0xff]   ;;  %v2734_v52 = vld [vmem:[#allocation5 + $0x348] ss:$16 sps:$4 sm:$0xff]  }
  0x6a   :  { %1507 = vmatpush1.bf16.msra.mxu0 %v2651_v53  ;;  %1679 = vmatpush1.bf16.msra.mxu1 %v2652_v54  ;;  %v2739_v53 = vld [vmem:[#allocation5 + $0x364] ss:$16 sps:$4 sm:$0xff]   ;;  %v2742_v54 = vld [vmem:[#allocation5 + $0x36c] ss:$16 sps:$4 sm:$0xff]  }
  0x6b   :  { %1508 = vmatprep.subr.bf16.mxu0 %v2653_v55  ;;  %1680 = vmatprep.subr.bf16.mxu1 %v2655_v56  ;;  %v2737_v55 = vld [vmem:[#allocation5 + $0x360] ss:$16 sps:$4 sm:$0xff]   ;;  %v2740_v56 = vld [vmem:[#allocation5 + $0x368] ss:$16 sps:$4 sm:$0xff]  }
  0x6e   :  { %1509 = vmatpush1.bf16.msra.mxu0 %v2657_v57  ;;  %1681 = vmatpush1.bf16.msra.mxu1 %v2658_v58  ;;  %v2745_v57 = vld [vmem:[#allocation5 + $0x384] ss:$16 sps:$4 sm:$0xff]   ;;  %v2748_v58 = vld [vmem:[#allocation5 + $0x38c] ss:$16 sps:$4 sm:$0xff]  }
  0x6f   :  { %1510 = vmatprep.subr.bf16.mxu0 %v2659_v59  ;;  %1682 = vmatprep.subr.bf16.mxu1 %v2661_v60  ;;  %v2743_v59 = vld [vmem:[#allocation5 + $0x380] ss:$16 sps:$4 sm:$0xff]   ;;  %v2746_v60 = vld [vmem:[#allocation5 + $0x388] ss:$16 sps:$4 sm:$0xff]  }
  0x72   :  { %1511 = vmatpush1.bf16.msra.mxu0 %v2663_v61  ;;  %1683 = vmatpush1.bf16.msra.mxu1 %v2664_v62  ;;  %v2751_v61 = vld [vmem:[#allocation5 + $0x3a4] ss:$16 sps:$4 sm:$0xff]   ;;  %v2754_v62 = vld [vmem:[#allocation5 + $0x3ac] ss:$16 sps:$4 sm:$0xff]  }
  0x73   :  { %1512 = vmatprep.subr.bf16.mxu0 %v2665_v63  ;;  %1684 = vmatprep.subr.bf16.mxu1 %v2667_v0  ;;  %v2749_v63 = vld [vmem:[#allocation5 + $0x3a0] ss:$16 sps:$4 sm:$0xff]   ;;  %v2752_v0 = vld [vmem:[#allocation5 + $0x3a8] ss:$16 sps:$4 sm:$0xff]  }
  0x76   :  { %1513 = vmatpush1.bf16.msra.mxu0 %v2669_v1  ;;  %1685 = vmatpush1.bf16.msra.mxu1 %v2670_v2  ;;  %v2757_v1 = vld [vmem:[#allocation5 + $0x3c4] ss:$16 sps:$4 sm:$0xff]   ;;  %v2760_v2 = vld [vmem:[#allocation5 + $0x3cc] ss:$16 sps:$4 sm:$0xff]  }
  0x77   :  { %1525 = vmatprep.subr.bf16.mxu0 %v2673_v3  ;;  %1697 = vmatprep.subr.bf16.mxu1 %v2676_v6  ;;  %v2755_v3 = vld [vmem:[#allocation5 + $0x3c0] ss:$16 sps:$4 sm:$0xff]   ;;  %v2766_v6 = vld [vmem:[#allocation5 + $0x3ec] ss:$16 sps:$4 sm:$0xff]  }
  0x79   :  { %1515 = vmatmul.mubr.bf16.vlgmr.msra.gmra.mrb[0].mxu0 %v79_v9  ;;  %1687 = vmatmul.mubr.bf16.vlgmr.msra.gmra.mrb[0].mxu1 %v79_v9  ;;  %v2769_v9 = vld [vmem:[#allocation5 + $0x404] ss:$16 sps:$4 sm:$0xff]  }
  0x7a   :  { %1526 = vmatpush1.bf16.msra.mxu0 %v2671_v7  ;;  %1698 = vmatpush1.bf16.msra.mxu1 %v2674_v8  ;;  %v2761_v7 = vld [vmem:[#allocation5 + $0x3e0] ss:$16 sps:$4 sm:$0xff]   ;;  %v2764_v8 = vld [vmem:[#allocation5 + $0x3e8] ss:$16 sps:$4 sm:$0xff]  }
  0x7b   :  { %1527 = vmatprep.subr.bf16.mxu0 %v2679_v10  ;;  %1699 = vmatprep.subr.bf16.mxu1 %v2682_v11  ;;  %v65_v10 = vld [vmem:[#allocation2 + $0x10] sm:$0xff] }
  0x7c   :  { %1557 = vmatprep.mubr.bf16.mxu0 %v82_v36  ;;  %1729 = vmatprep.mubr.bf16.mxu1 %v82_v36  ;;  %v73_v11 = vld [vmem:[#allocation2 + $0x50] sm:$0xff]  ;;  %v2802_v36 = vld [vmem:[#allocation5 + $0x4ac] ss:$16 sps:$4 sm:$0xff]  }
  0x7e   :  { %1528 = vmatpush1.bf16.msra.mxu0 %v2677_v12  ;;  %1700 = vmatpush1.bf16.msra.mxu1 %v2680_v13  ;;  %v2772_v12 = vld [vmem:[#allocation5 + $0x40c] ss:$16 sps:$4 sm:$0xff]   ;;  %v2767_v13 = vld [vmem:[#allocation5 + $0x400] ss:$16 sps:$4 sm:$0xff]  }
  0x7f   :  { %1529 = vmatprep.subr.bf16.mxu0 %v2685_v14  ;;  %1701 = vmatprep.subr.bf16.mxu1 %v2688_v15  ;;  %v2770_v14 = vld [vmem:[#allocation5 + $0x408] ss:$16 sps:$4 sm:$0xff]   ;;  %v81_v15 = vpack.c.bf16 %v73_v11, %v65_v10  ;;  %v2859_v11 = vld [vmem:[#allocation5 + $0x5e4] ss:$16 sps:$4 sm:$0xff]  }
  0x80   :  { %v2854_v10 = vld [vmem:[#allocation5 + $0x5c8] ss:$16 sps:$4 sm:$0xff]  }
  0x82   :  { %1530 = vmatpush1.bf16.msra.mxu0 %v2683_v16  ;;  %1702 = vmatpush1.bf16.msra.mxu1 %v2686_v17  ;;  %v2775_v16 = vld [vmem:[#allocation5 + $0x424] ss:$16 sps:$4 sm:$0xff]   ;;  %v2778_v17 = vld [vmem:[#allocation5 + $0x42c] ss:$16 sps:$4 sm:$0xff]  }
  0x83   :  { %1531 = vmatprep.subr.bf16.mxu0 %v2691_v18  ;;  %1703 = vmatprep.subr.bf16.mxu1 %v2694_v19  ;;  %v68_v18 = vld [vmem:[#allocation2 + $0x28] sm:$0xff] }
  0x84   :  { %v76_v19 = vld [vmem:[#allocation2 + $0x68] sm:$0xff] }
  0x86   :  { %1532 = vmatpush1.bf16.msra.mxu0 %v2689_v20  ;;  %1704 = vmatpush1.bf16.msra.mxu1 %v2692_v21  ;;  %v2773_v20 = vld [vmem:[#allocation5 + $0x420] ss:$16 sps:$4 sm:$0xff]   ;;  %v2776_v21 = vld [vmem:[#allocation5 + $0x428] ss:$16 sps:$4 sm:$0xff]  }
  0x87   :  { %1533 = vmatprep.subr.bf16.mxu0 %v2697_v22  ;;  %1705 = vmatprep.subr.bf16.mxu1 %v2700_v23  ;;  %v84_v22 = vpack.c.bf16 %v76_v19, %v68_v18  ;;  %v2781_v23 = vld [vmem:[#allocation5 + $0x444] ss:$16 sps:$4 sm:$0xff]   ;;  %v2868_v18 = vld [vmem:[#allocation5 + $0x60c] ss:$16 sps:$4 sm:$0xff]  }
  0x8a   :  { %1534 = vmatpush1.bf16.msra.mxu0 %v2695_v24  ;;  %1706 = vmatpush1.bf16.msra.mxu1 %v2698_v25  ;;  %v2784_v24 = vld [vmem:[#allocation5 + $0x44c] ss:$16 sps:$4 sm:$0xff]   ;;  %v2779_v25 = vld [vmem:[#allocation5 + $0x440] ss:$16 sps:$4 sm:$0xff]  }
  0x8b   :  { %1535 = vmatprep.subr.bf16.mxu0 %v2703_v26  ;;  %1707 = vmatprep.subr.bf16.mxu1 %v2706_v27  ;;  %v2782_v26 = vld [vmem:[#allocation5 + $0x448] ss:$16 sps:$4 sm:$0xff]   ;;  %v2787_v27 = vld [vmem:[#allocation5 + $0x464] ss:$16 sps:$4 sm:$0xff]  }
  0x8e   :  { %1536 = vmatpush1.bf16.msra.mxu0 %v2701_v28  ;;  %1708 = vmatpush1.bf16.msra.mxu1 %v2704_v29  ;;  %v2790_v28 = vld [vmem:[#allocation5 + $0x46c] ss:$16 sps:$4 sm:$0xff]   ;;  %v2785_v29 = vld [vmem:[#allocation5 + $0x460] ss:$16 sps:$4 sm:$0xff]  }
  0x8f   :  { %1537 = vmatprep.subr.bf16.mxu0 %v2709_v30  ;;  %1709 = vmatprep.subr.bf16.mxu1 %v2712_v31  ;;  %v2788_v30 = vld [vmem:[#allocation5 + $0x468] ss:$16 sps:$4 sm:$0xff]   ;;  %v2793_v31 = vld [vmem:[#allocation5 + $0x484] ss:$16 sps:$4 sm:$0xff]  }
  0x92   :  { %1538 = vmatpush1.bf16.msra.mxu0 %v2707_v34  ;;  %1710 = vmatpush1.bf16.msra.mxu1 %v2710_v35  ;;  %v2794_v34 = vld [vmem:[#allocation5 + $0x488] ss:$16 sps:$4 sm:$0xff]   ;;  %v2799_v35 = vld [vmem:[#allocation5 + $0x4a4] ss:$16 sps:$4 sm:$0xff]  }
  0x93   :  { %1539 = vmatprep.subr.bf16.mxu0 %v2715_v37  ;;  %1711 = vmatprep.subr.bf16.mxu1 %v2718_v38  ;;  %v2797_v37 = vld [vmem:[#allocation5 + $0x4a0] ss:$16 sps:$4 sm:$0xff]   ;;  %v2800_v38 = vld [vmem:[#allocation5 + $0x4a8] ss:$16 sps:$4 sm:$0xff]  }
  0x96   :  { %1540 = vmatpush1.bf16.msra.mxu0 %v2713_v39  ;;  %1712 = vmatpush1.bf16.msra.mxu1 %v2716_v40  ;;  %v2805_v39 = vld [vmem:[#allocation5 + $0x4c4] ss:$16 sps:$4 sm:$0xff]   ;;  %v2808_v40 = vld [vmem:[#allocation5 + $0x4cc] ss:$16 sps:$4 sm:$0xff]  }
  0x97   :  { %1541 = vmatprep.subr.bf16.mxu0 %v2721_v41  ;;  %1713 = vmatprep.subr.bf16.mxu1 %v2724_v42  ;;  %v2803_v41 = vld [vmem:[#allocation5 + $0x4c0] ss:$16 sps:$4 sm:$0xff]   ;;  %v2806_v42 = vld [vmem:[#allocation5 + $0x4c8] ss:$16 sps:$4 sm:$0xff]  }
  0x9a   :  { %1542 = vmatpush1.bf16.msra.mxu0 %v2719_v43  ;;  %1714 = vmatpush1.bf16.msra.mxu1 %v2722_v44  ;;  %v2811_v43 = vld [vmem:[#allocation5 + $0x4e4] ss:$16 sps:$4 sm:$0xff]   ;;  %v2814_v44 = vld [vmem:[#allocation5 + $0x4ec] ss:$16 sps:$4 sm:$0xff]  }
  0x9b   :  { %1543 = vmatprep.subr.bf16.mxu0 %v2727_v45  ;;  %1715 = vmatprep.subr.bf16.mxu1 %v2730_v46  ;;  %v2809_v45 = vld [vmem:[#allocation5 + $0x4e0] ss:$16 sps:$4 sm:$0xff]   ;;  %v2812_v46 = vld [vmem:[#allocation5 + $0x4e8] ss:$16 sps:$4 sm:$0xff]  }
  0x9e   :  { %1544 = vmatpush1.bf16.msra.mxu0 %v2725_v47  ;;  %1716 = vmatpush1.bf16.msra.mxu1 %v2728_v48  ;;  %v2817_v47 = vld [vmem:[#allocation5 + $0x504] ss:$16 sps:$4 sm:$0xff]   ;;  %v2820_v48 = vld [vmem:[#allocation5 + $0x50c] ss:$16 sps:$4 sm:$0xff]  }
  0x9f   :  { %1545 = vmatprep.subr.bf16.mxu0 %v2733_v49  ;;  %1717 = vmatprep.subr.bf16.mxu1 %v2736_v50  ;;  %v2815_v49 = vld [vmem:[#allocation5 + $0x500] ss:$16 sps:$4 sm:$0xff]   ;;  %v2818_v50 = vld [vmem:[#allocation5 + $0x508] ss:$16 sps:$4 sm:$0xff]  }
  0xa2   :  { %1546 = vmatpush1.bf16.msra.mxu0 %v2731_v51  ;;  %1718 = vmatpush1.bf16.msra.mxu1 %v2734_v52  ;;  %v2823_v51 = vld [vmem:[#allocation5 + $0x524] ss:$16 sps:$4 sm:$0xff]   ;;  %v2826_v52 = vld [vmem:[#allocation5 + $0x52c] ss:$16 sps:$4 sm:$0xff]  }
  0xa3   :  { %1547 = vmatprep.subr.bf16.mxu0 %v2739_v53  ;;  %1719 = vmatprep.subr.bf16.mxu1 %v2742_v54  ;;  %v2821_v53 = vld [vmem:[#allocation5 + $0x520] ss:$16 sps:$4 sm:$0xff]   ;;  %v2824_v54 = vld [vmem:[#allocation5 + $0x528] ss:$16 sps:$4 sm:$0xff]  }
  0xa6   :  { %1548 = vmatpush1.bf16.msra.mxu0 %v2737_v55  ;;  %1720 = vmatpush1.bf16.msra.mxu1 %v2740_v56  ;;  %v2829_v55 = vld [vmem:[#allocation5 + $0x544] ss:$16 sps:$4 sm:$0xff]   ;;  %v2832_v56 = vld [vmem:[#allocation5 + $0x54c] ss:$16 sps:$4 sm:$0xff]  }
  0xa7   :  { %1549 = vmatprep.subr.bf16.mxu0 %v2745_v57  ;;  %1721 = vmatprep.subr.bf16.mxu1 %v2748_v58  ;;  %v2827_v57 = vld [vmem:[#allocation5 + $0x540] ss:$16 sps:$4 sm:$0xff]   ;;  %v2830_v58 = vld [vmem:[#allocation5 + $0x548] ss:$16 sps:$4 sm:$0xff]  }
  0xaa   :  { %1550 = vmatpush1.bf16.msra.mxu0 %v2743_v59  ;;  %1722 = vmatpush1.bf16.msra.mxu1 %v2746_v60  ;;  %v2835_v59 = vld [vmem:[#allocation5 + $0x564] ss:$16 sps:$4 sm:$0xff]   ;;  %v2838_v60 = vld [vmem:[#allocation5 + $0x56c] ss:$16 sps:$4 sm:$0xff]  }
  0xab   :  { %1551 = vmatprep.subr.bf16.mxu0 %v2751_v61  ;;  %1723 = vmatprep.subr.bf16.mxu1 %v2754_v62  ;;  %v2833_v61 = vld [vmem:[#allocation5 + $0x560] ss:$16 sps:$4 sm:$0xff]   ;;  %v2836_v62 = vld [vmem:[#allocation5 + $0x568] ss:$16 sps:$4 sm:$0xff]  }
  0xae   :  { %1552 = vmatpush1.bf16.msra.mxu0 %v2749_v63  ;;  %1724 = vmatpush1.bf16.msra.mxu1 %v2752_v0  ;;  %v2841_v63 = vld [vmem:[#allocation5 + $0x584] ss:$16 sps:$4 sm:$0xff]   ;;  %v2844_v0 = vld [vmem:[#allocation5 + $0x58c] ss:$16 sps:$4 sm:$0xff]  }
  0xaf   :  { %1553 = vmatprep.subr.bf16.mxu0 %v2757_v1  ;;  %1725 = vmatprep.subr.bf16.mxu1 %v2760_v2  ;;  %v2839_v1 = vld [vmem:[#allocation5 + $0x580] ss:$16 sps:$4 sm:$0xff]   ;;  %v2842_v2 = vld [vmem:[#allocation5 + $0x588] ss:$16 sps:$4 sm:$0xff]  }
  0xb2   :  { %1554 = vmatpush1.bf16.msra.mxu0 %v2755_v3  ;;  %1726 = vmatpush1.bf16.msra.mxu1 %v2758_v4  ;;  %v2847_v3 = vld [vmem:[#allocation5 + $0x5a4] ss:$16 sps:$4 sm:$0xff]   ;;  %v2850_v4 = vld [vmem:[#allocation5 + $0x5ac] ss:$16 sps:$4 sm:$0xff]  }
  0xb3   :  { %1555 = vmatprep.subr.bf16.mxu0 %v2763_v5  ;;  %1727 = vmatprep.subr.bf16.mxu1 %v2766_v6  ;;  %v2845_v5 = vld [vmem:[#allocation5 + $0x5a0] ss:$16 sps:$4 sm:$0xff]   ;;  %v2848_v6 = vld [vmem:[#allocation5 + $0x5a8] ss:$16 sps:$4 sm:$0xff]  }
  0xb6   :  { %1556 = vmatpush1.bf16.msra.mxu0 %v2761_v7  ;;  %1728 = vmatpush1.bf16.msra.mxu1 %v2764_v8  ;;  %v2853_v7 = vld [vmem:[#allocation5 + $0x5c4] ss:$16 sps:$4 sm:$0xff]   ;;  %v2856_v8 = vld [vmem:[#allocation5 + $0x5cc] ss:$16 sps:$4 sm:$0xff]  }
  0xb7   :  { %1568 = vmatprep.subr.bf16.mxu0 %v2769_v9  ;;  %1740 = vmatprep.subr.bf16.mxu1 %v2772_v12  ;;  %v2851_v9 = vld [vmem:[#allocation5 + $0x5c0] ss:$16 sps:$4 sm:$0xff]   ;;  %v2862_v12 = vld [vmem:[#allocation5 + $0x5ec] ss:$16 sps:$4 sm:$0xff]  }
  0xb9   :  { %1558 = vmatmul.mubr.bf16.vlgmr.msra.gmra.mrb[0].mxu0 %v81_v15  ;;  %1730 = vmatmul.mubr.bf16.vlgmr.msra.gmra.mrb[0].mxu1 %v81_v15  ;;  %v67_v15 = vld [vmem:[#allocation2 + $0x20] sm:$0xff] }
  0xba   :  { %1569 = vmatpush1.bf16.msra.mxu0 %v2767_v13  ;;  %1741 = vmatpush1.bf16.msra.mxu1 %v2770_v14  ;;  %v2857_v13 = vld [vmem:[#allocation5 + $0x5e0] ss:$16 sps:$4 sm:$0xff]   ;;  %v2860_v14 = vld [vmem:[#allocation5 + $0x5e8] ss:$16 sps:$4 sm:$0xff]  }
  0xbb   :  { %1570 = vmatprep.subr.bf16.mxu0 %v2775_v16  ;;  %1742 = vmatprep.subr.bf16.mxu1 %v2778_v17  ;;  %v75_v16 = vld [vmem:[#allocation2 + $0x60] sm:$0xff] }
  0xbc   :  { %1600 = vmatprep.mubr.bf16.mxu0 %v84_v22  ;;  %1772 = vmatprep.mubr.bf16.mxu1 %v84_v22  ;;  %v2865_v17 = vld [vmem:[#allocation5 + $0x604] ss:$16 sps:$4 sm:$0xff]   ;;  %v83_v19 = vpack.c.bf16 %v75_v16, %v67_v15  ;;  %v2863_v22 = vld [vmem:[#allocation5 + $0x600] ss:$16 sps:$4 sm:$0xff]   ;;  %v2930_v15 = vld [vmem:[#allocation7 + $0x98] sm:$0xff]  }
  0xbd   :  { %v2931_v16 = vld [vmem:[#allocation7 + $0x60] sm:$0xff]  }
  0xbe   :  { %1571 = vmatpush1.bf16.msra.mxu0 %v2773_v20  ;;  %1743 = vmatpush1.bf16.msra.mxu1 %v2776_v21  ;;  %v70_v20 = vld [vmem:[#allocation2 + $0x38] sm:$0xff] }
  0xbf   :  { %1572 = vmatprep.subr.bf16.mxu0 %v2781_v23  ;;  %1744 = vmatprep.subr.bf16.mxu1 %v2784_v24  ;;  %v78_v21 = vld [vmem:[#allocation2 + $0x78] sm:$0xff]  ;;  %v2871_v24 = vld [vmem:[#allocation5 + $0x624] ss:$16 sps:$4 sm:$0xff]  }
  0xc0   :  { %v2866_v23 = vld [vmem:[#allocation5 + $0x608] ss:$16 sps:$4 sm:$0xff]  }
  0xc2   :  { %1573 = vmatpush1.bf16.msra.mxu0 %v2779_v25  ;;  %1745 = vmatpush1.bf16.msra.mxu1 %v2782_v26  ;;  %v2874_v25 = vld [vmem:[#allocation5 + $0x62c] ss:$16 sps:$4 sm:$0xff]   ;;  %v86_v26 = vpack.c.bf16 %v78_v21, %v70_v20 }
  0xc3   :  { %1574 = vmatprep.subr.bf16.mxu0 %v2787_v27  ;;  %1746 = vmatprep.subr.bf16.mxu1 %v2790_v28  ;;  %v2869_v27 = vld [vmem:[#allocation5 + $0x620] ss:$16 sps:$4 sm:$0xff]   ;;  %v2872_v28 = vld [vmem:[#allocation5 + $0x628] ss:$16 sps:$4 sm:$0xff]  }
  0xc4   :  { %v2935_v20 = vld [vmem:[#allocation7 + $0x68] sm:$0xff]  }
  0xc5   :  { %v2936_v21 = vld [vmem:[#allocation7 + $0xe8] sm:$0xff]  }
  0xc6   :  { %1575 = vmatpush1.bf16.msra.mxu0 %v2785_v29  ;;  %1747 = vmatpush1.bf16.msra.mxu1 %v2788_v30  ;;  %v2877_v29 = vld [vmem:[#allocation5 + $0x644] ss:$16 sps:$4 sm:$0xff]   ;;  %v2880_v30 = vld [vmem:[#allocation5 + $0x64c] ss:$16 sps:$4 sm:$0xff]  }
  0xc7   :  { %1576 = vmatprep.subr.bf16.mxu0 %v2793_v31  ;;  %1748 = vmatprep.subr.bf16.mxu1 %v2796_v32  ;;  %v2875_v31 = vld [vmem:[#allocation5 + $0x640] ss:$16 sps:$4 sm:$0xff]   ;;  %v2878_v32 = vld [vmem:[#allocation5 + $0x648] ss:$16 sps:$4 sm:$0xff]  }
  0xca   :  { %1577 = vmatpush1.bf16.msra.mxu0 %v2791_v33  ;;  %1749 = vmatpush1.bf16.msra.mxu1 %v2794_v34  ;;  %v2883_v33 = vld [vmem:[#allocation5 + $0x664] ss:$16 sps:$4 sm:$0xff]   ;;  %v2886_v34 = vld [vmem:[#allocation5 + $0x66c] ss:$16 sps:$4 sm:$0xff]  }
  0xcb   :  { %1578 = vmatprep.subr.bf16.mxu0 %v2799_v35  ;;  %1750 = vmatprep.subr.bf16.mxu1 %v2802_v36  ;;  %v2881_v35 = vld [vmem:[#allocation5 + $0x660] ss:$16 sps:$4 sm:$0xff]   ;;  %v2884_v36 = vld [vmem:[#allocation5 + $0x668] ss:$16 sps:$4 sm:$0xff]  }
  0xce   :  { %1579 = vmatpush1.bf16.msra.mxu0 %v2797_v37  ;;  %1751 = vmatpush1.bf16.msra.mxu1 %v2800_v38  ;;  %v2889_v37 = vld [vmem:[#allocation5 + $0x684] ss:$16 sps:$4 sm:$0xff]   ;;  %v2892_v38 = vld [vmem:[#allocation5 + $0x68c] ss:$16 sps:$4 sm:$0xff]  }
  0xcf   :  { %1580 = vmatprep.subr.bf16.mxu0 %v2805_v39  ;;  %1752 = vmatprep.subr.bf16.mxu1 %v2808_v40  ;;  %v2887_v39 = vld [vmem:[#allocation5 + $0x680] ss:$16 sps:$4 sm:$0xff]   ;;  %v2890_v40 = vld [vmem:[#allocation5 + $0x688] ss:$16 sps:$4 sm:$0xff]  }
  0xd2   :  { %1581 = vmatpush1.bf16.msra.mxu0 %v2803_v41  ;;  %1753 = vmatpush1.bf16.msra.mxu1 %v2806_v42  ;;  %v2895_v41 = vld [vmem:[#allocation5 + $0x6a4] ss:$16 sps:$4 sm:$0xff]   ;;  %v2898_v42 = vld [vmem:[#allocation5 + $0x6ac] ss:$16 sps:$4 sm:$0xff]  }
  0xd3   :  { %1582 = vmatprep.subr.bf16.mxu0 %v2811_v43  ;;  %1754 = vmatprep.subr.bf16.mxu1 %v2814_v44  ;;  %v2893_v43 = vld [vmem:[#allocation5 + $0x6a0] ss:$16 sps:$4 sm:$0xff]   ;;  %v2896_v44 = vld [vmem:[#allocation5 + $0x6a8] ss:$16 sps:$4 sm:$0xff]  }
  0xd6   :  { %1583 = vmatpush1.bf16.msra.mxu0 %v2809_v45  ;;  %1755 = vmatpush1.bf16.msra.mxu1 %v2812_v46  ;;  %v2901_v45 = vld [vmem:[#allocation5 + $0x6c4] ss:$16 sps:$4 sm:$0xff]   ;;  %v2904_v46 = vld [vmem:[#allocation5 + $0x6cc] ss:$16 sps:$4 sm:$0xff]  }
  0xd7   :  { %1584 = vmatprep.subr.bf16.mxu0 %v2817_v47  ;;  %1756 = vmatprep.subr.bf16.mxu1 %v2820_v48  ;;  %v2899_v47 = vld [vmem:[#allocation5 + $0x6c0] ss:$16 sps:$4 sm:$0xff]   ;;  %v2902_v48 = vld [vmem:[#allocation5 + $0x6c8] ss:$16 sps:$4 sm:$0xff]  }
  0xda   :  { %1585 = vmatpush1.bf16.msra.mxu0 %v2815_v49  ;;  %1757 = vmatpush1.bf16.msra.mxu1 %v2818_v50  ;;  %v2907_v49 = vld [vmem:[#allocation5 + $0x6e4] ss:$16 sps:$4 sm:$0xff]   ;;  %v2910_v50 = vld [vmem:[#allocation5 + $0x6ec] ss:$16 sps:$4 sm:$0xff]  }
  0xdb   :  { %1586 = vmatprep.subr.bf16.mxu0 %v2823_v51  ;;  %1758 = vmatprep.subr.bf16.mxu1 %v2826_v52  ;;  %v311_v51 = vld [vmem:[#allocation5 + $0x700] sm:$0x33]  ;;  %v312_v52 = vld [vmem:[#allocation5 + $0x708] sm:$0x33] }
  0xde   :  { %1587 = vmatpush1.bf16.msra.mxu0 %v2821_v53  ;;  %1759 = vmatpush1.bf16.msra.mxu1 %v2824_v54  ;;  %v2905_v53 = vld [vmem:[#allocation5 + $0x6e0] ss:$16 sps:$4 sm:$0xff]   ;;  %v2908_v54 = vld [vmem:[#allocation5 + $0x6e8] ss:$16 sps:$4 sm:$0xff]  }
  0xdf   :  { %1588 = vmatprep.subr.bf16.mxu0 %v2829_v55  ;;  %1760 = vmatprep.subr.bf16.mxu1 %v2832_v56  ;;  %v2448_v55 = vcombine.high %v311_v51, %v311_v51  ;;  %v2450_v56 = vcombine.high %v312_v52, %v312_v52 }
  0xe2   :  { %1589 = vmatpush1.bf16.msra.mxu0 %v2827_v57  ;;  %1761 = vmatpush1.bf16.msra.mxu1 %v2830_v58  ;;  %v2447_v57 = vcombine.low %v311_v51, %v311_v51  ;;  %v2449_v58 = vcombine.low %v312_v52, %v312_v52 }
  0xe3   :  { %1590 = vmatprep.subr.bf16.mxu0 %v2835_v59  ;;  %1762 = vmatprep.subr.bf16.mxu1 %v2838_v60  ;;  %v69_v59 = vld [vmem:[#allocation2 + $0x30] sm:$0xff] }
  0xe4   :  { %v77_v60 = vld [vmem:[#allocation2 + $0x70] sm:$0xff] }
  0xe6   :  { %1591 = vmatpush1.bf16.msra.mxu0 %v2833_v61  ;;  %1763 = vmatpush1.bf16.msra.mxu1 %v2836_v62  ;;  %v1471_v61 = vsel %vm1469_vm1, %v2447_v57, 0  ;;  %v1477_v62 = vsel %vm1469_vm1, %v2449_v58, 0 }
  0xe7   :  { %1592 = vmatprep.subr.bf16.mxu0 %v2841_v63  ;;  %1764 = vmatprep.subr.bf16.mxu1 %v2844_v0  ;;  %v2915_v63 = vld [vmem:[#allocation7 + $0x40] sm:$0xff]  }
  0xe8   :  { %v2916_v0 = vld [vmem:[#allocation7 + $0xc0] sm:$0xff]  }
  0xea   :  { %1593 = vmatpush1.bf16.msra.mxu0 %v2839_v1  ;;  %1765 = vmatpush1.bf16.msra.mxu1 %v2842_v2  ;;  %v85_v1 = vpack.c.bf16 %v77_v60, %v69_v59  ;;  %v2917_v2 = vld [vmem:[#allocation7] sm:$0xff]  }
  0xeb   :  { %1594 = vmatprep.subr.bf16.mxu0 %v2847_v3  ;;  %1766 = vmatprep.subr.bf16.mxu1 %v2850_v4  ;;  %v2918_v3 = vld [vmem:[#allocation7 + $0x80] sm:$0xff]   ;;  %v2919_v4 = vld [vmem:[#allocation7 + $0x48] sm:$0xff]  }
  0xee   :  { %1595 = vmatpush1.bf16.msra.mxu0 %v2845_v5  ;;  %1767 = vmatpush1.bf16.msra.mxu1 %v2848_v6  ;;  %v2920_v5 = vld [vmem:[#allocation7 + $0xc8] sm:$0xff]  }
  0xef   :  { %1596 = vmatprep.subr.bf16.mxu0 %v2853_v7  ;;  %1768 = vmatprep.subr.bf16.mxu1 %v2856_v8  ;;  %v2921_v6 = vld [vmem:[#allocation7 + $0x8] sm:$0xff]   ;;  %v2923_v8 = vld [vmem:[#allocation7 + $0x50] sm:$0xff]  }
  0xf0   :  { %v2922_v7 = vld [vmem:[#allocation7 + $0x88] sm:$0xff]  }
  0xf2   :  { %1597 = vmatpush1.bf16.msra.mxu0 %v2851_v9  ;;  %1769 = vmatpush1.bf16.msra.mxu1 %v2854_v10  ;;  %v2924_v9 = vld [vmem:[#allocation7 + $0xd0] sm:$0xff]  }
  0xf3   :  { %1598 = vmatprep.subr.bf16.mxu0 %v2859_v11  ;;  %1770 = vmatprep.subr.bf16.mxu1 %v2862_v12  ;;  %v2925_v10 = vld [vmem:[#allocation7 + $0x10] sm:$0xff]   ;;  %v2927_v12 = vld [vmem:[#allocation7 + $0x58] sm:$0xff]  }
  0xf4   :  { %v2926_v11 = vld [vmem:[#allocation7 + $0x90] sm:$0xff]  }
  0xf6   :  { %1599 = vmatpush1.bf16.msra.mxu0 %v2857_v13  ;;  %1771 = vmatpush1.bf16.msra.mxu1 %v2860_v14  ;;  %v2928_v13 = vld [vmem:[#allocation7 + $0xd8] sm:$0xff]  }
  0xf7   :  { %1611 = vmatprep.subr.bf16.mxu0 %v2865_v17  ;;  %1783 = vmatprep.subr.bf16.mxu1 %v2868_v18  ;;  %v2929_v14 = vld [vmem:[#allocation7 + $0x18] sm:$0xff]   ;;  %v2932_v17 = vld [vmem:[#allocation7 + $0xe0] sm:$0xff]  }
  0xf8   :  { %v2933_v18 = vld [vmem:[#allocation7 + $0x20] sm:$0xff]  }
  0xf9   :  { %1601 = vmatmul.mubr.bf16.vlgmr.msra.gmra.mrb[0].mxu0 %v83_v19  ;;  %1773 = vmatmul.mubr.bf16.vlgmr.msra.gmra.mrb[0].mxu1 %v83_v19  ;;  %v2934_v19 = vld [vmem:[#allocation7 + $0xa0] sm:$0xff]  }
  0xfa   :  { %1612 = vmatpush1.bf16.msra.mxu0 %v2863_v22  ;;  %1784 = vmatpush1.bf16.msra.mxu1 %v2866_v23  ;;  %v2937_v22 = vld [vmem:[#allocation7 + $0x28] sm:$0xff]  }
  0xfb   :  { %1613 = vmatprep.subr.bf16.mxu0 %v2871_v24  ;;  %1785 = vmatprep.subr.bf16.mxu1 %v2874_v25  ;;  %v2938_v23 = vld [vmem:[#allocation7 + $0xa8] sm:$0xff]   ;;  %v2939_v24 = vld [vmem:[#allocation7 + $0x70] sm:$0xff]  }
  0xfc   :  { %2452 = vmatprep.mubr.msk.bf16.mxu0 %vm1465_vm0, %v86_v26  ;;  %2454 = vmatprep.mubr.msk.bf16.mxu1 %vm1465_vm0, %v86_v26  ;;  %v2940_v25 = vld [vmem:[#allocation7 + $0xf0] sm:$0xff]  }
  0xfd   :  { %v2941_v26 = vld [vmem:[#allocation7 + $0x30] sm:$0xff]  }
  0xfe   :  { %1614 = vmatpush1.bf16.msra.mxu0 %v2869_v27  ;;  %1786 = vmatpush1.bf16.msra.mxu1 %v2872_v28  ;;  %v2942_v27 = vld [vmem:[#allocation7 + $0xb0] sm:$0xff]   ;;  %v2943_v28 = vld [vmem:[#allocation7 + $0x78] sm:$0xff]  }
  0xff   :  { %1615 = vmatprep.subr.bf16.mxu0 %v2877_v29  ;;  %1787 = vmatprep.subr.bf16.mxu1 %v2880_v30  ;;  %v2944_v29 = vld [vmem:[#allocation7 + $0xf8] sm:$0xff]  }
 0x100   :  { %v2945_v30 = vld [vmem:[#allocation7 + $0x38] sm:$0xff]  }
 0x102   :  { %1616 = vmatpush1.bf16.msra.mxu0 %v2875_v31  ;;  %1788 = vmatpush1.bf16.msra.mxu1 %v2878_v32  ;;  %v2946_v31 = vld [vmem:[#allocation7 + $0xb8] sm:$0xff]   ;;  %v315_v32 = vlaneseq }
 0x103   :  { %1617 = vmatprep.subr.bf16.mxu0 %v2883_v33  ;;  %1789 = vmatprep.subr.bf16.mxu1 %v2886_v34 }
 0x104   :  { %v316_v33 = vshrl.u32 %v315_v32, 7 }
 0x106   :  { %1618 = vmatpush1.bf16.msra.mxu0 %v2881_v35  ;;  %1790 = vmatpush1.bf16.msra.mxu1 %v2884_v36  ;;  %v317_v34 = vsub.s32 0, %v316_v33  ;;  %v325_v35 = vsub.s32 2, %v316_v33  ;;  %v313_v36 = vld [vmem:[%s3146_s2] sm:$0xf] }
 0x107   :  { %1619 = vmatprep.subr.bf16.mxu0 %v2889_v37  ;;  %1791 = vmatprep.subr.bf16.mxu1 %v2892_v38  ;;  %v321_v37 = vsub.s32 1, %v316_v33  ;;  %v329_v38 = vsub.s32 3, %v316_v33 }
 0x10a   :  { %1620 = vmatpush1.bf16.msra.mxu0 %v2887_v39  ;;  %1792 = vmatpush1.bf16.msra.mxu1 %v2890_v40  ;;  %v318_v39 = vrot.slane %v313_v36, %v317_v34  ;;  %v326_v40 = vrot.slane %v313_v36, %v325_v35 }
 0x10b   :  { %1621 = vmatprep.subr.bf16.mxu0 %v2895_v41  ;;  %1793 = vmatprep.subr.bf16.mxu1 %v2898_v42  ;;  %v322_v41 = vrot.slane %v313_v36, %v321_v37  ;;  %v330_v42 = vrot.slane %v313_v36, %v329_v38 }
 0x10e   :  { %1622 = vmatpush1.bf16.msra.mxu0 %v2893_v43  ;;  %1794 = vmatpush1.bf16.msra.mxu1 %v2896_v44 }
 0x10f   :  { %1623 = vmatprep.subr.bf16.mxu0 %v2901_v45  ;;  %1795 = vmatprep.subr.bf16.mxu1 %v2904_v46 }
 0x112   :  { %1624 = vmatpush1.bf16.msra.mxu0 %v2899_v47  ;;  %1796 = vmatpush1.bf16.msra.mxu1 %v2902_v48 }
 0x113   :  { %1625 = vmatprep.subr.bf16.mxu0 %v2907_v49  ;;  %1797 = vmatprep.subr.bf16.mxu1 %v2910_v50 }
 0x116   :  { %1626 = vmatpush1.bf16.msra.mxu0 %v2905_v53  ;;  %1798 = vmatpush1.bf16.msra.mxu1 %v2908_v54 }
 0x117   :  { %2451 = vmatprep.subr.msk.bf16.mxu0 %vm1469_vm1, %v2448_v55  ;;  %2453 = vmatprep.subr.msk.bf16.mxu1 %vm1469_vm1, %v2450_v56 }
 0x11a   :  { %1628 = vmatpush1.bf16.msra.mxu0 %v1471_v61  ;;  %1800 = vmatpush1.bf16.msra.mxu1 %v1477_v62 }
 0x11b   :  { %2488 = vmatprep.subr.bf16.mxu0 %v2915_v63  ;;  %2510 = vmatprep.subr.bf16.mxu1 %v2916_v0 }
 0x11d   :  { %1644 = vmatmul.mubr.bf16.vlgmr.msra.gmra.mrb[0].mxu0 %v85_v1  ;;  %1816 = vmatmul.mubr.bf16.vlgmr.msra.gmra.mrb[0].mxu1 %v85_v1 }
 0x11e   :  { %2489 = vmatpush3.bf16.msra.mxu0 %v2917_v2  ;;  %2511 = vmatpush3.bf16.msra.mxu1 %v2918_v3 }
 0x11f   :  { %2490 = vmatprep.subr.bf16.mxu0 %v2919_v4  ;;  %2512 = vmatprep.subr.bf16.mxu1 %v2920_v5 }
 0x122   :  { %2491 = vmatpush3.bf16.msra.mxu0 %v2921_v6  ;;  %2513 = vmatpush3.bf16.msra.mxu1 %v2922_v7 }
 0x123   :  { %2492 = vmatprep.subr.bf16.mxu0 %v2923_v8  ;;  %2514 = vmatprep.subr.bf16.mxu1 %v2924_v9  ;;  %v2455_v9 = vld [vmem:[%s3148_s4] ss:$0 sm:$0xff]  ;;  %s3057_s4 = smov [#allocation8]  }
 0x124   :  { %s2210_s9 = sshll.u32 %s3057_s4, 4  ;;  %s2211_s9 = int_to_ptr.vmem [resolvable:$true] %s2210_s9 }
 0x125   :  { %s3021_s10 = scalar_lea.vmem %s2211_s9, 256  ;;  %p3026_p11 = scmp.lt.s32.totalorder %s2211_s9, %s2211_s9 }
 0x126   :  { %2493 = vmatpush3.bf16.msra.mxu0 %v2925_v10  ;;  %2515 = vmatpush3.bf16.msra.mxu1 %v2926_v11  ;;  %p3022_p10 = scmp.ne.s32.totalorder %s2211_s9, %s3021_s10  ;;  %p3027_p12 = scmp.lt.s32.totalorder %s3021_s10, %s3021_s10 }
 0x127   :  { %2494 = vmatprep.subr.bf16.mxu0 %v2927_v12  ;;  %2516 = vmatprep.subr.bf16.mxu1 %v2928_v13 }
 0x128   :  { %p3028_p13 = por %p3027_p12, %p3026_p11 }
 0x12a   :  { %2495 = vmatpush3.bf16.msra.mxu0 %v2929_v14  ;;  %2517 = vmatpush3.bf16.msra.mxu1 %v2930_v15  ;;  %p3029_p0 = pnand %p3028_p13, %p3022_p10 }
 0x12b   :  { %2496 = vmatprep.subr.bf16.mxu0 %v2931_v16  ;;  %2518 = vmatprep.subr.bf16.mxu1 %v2932_v17 }
 0x12e   :  { %2497 = vmatpush3.bf16.msra.mxu0 %v2933_v18  ;;  %2519 = vmatpush3.bf16.msra.mxu1 %v2934_v19 }
 0x12f   :  { %2498 = vmatprep.subr.bf16.mxu0 %v2935_v20  ;;  %2520 = vmatprep.subr.bf16.mxu1 %v2936_v21 }
 0x132   :  { %2499 = vmatpush3.bf16.msra.mxu0 %v2937_v22  ;;  %2521 = vmatpush3.bf16.msra.mxu1 %v2938_v23 }
 0x133   :  { %2500 = vmatprep.subr.bf16.mxu0 %v2939_v24  ;;  %2522 = vmatprep.subr.bf16.mxu1 %v2940_v25 }
 0x136   :  { %2501 = vmatpush3.bf16.msra.mxu0 %v2941_v26  ;;  %2523 = vmatpush3.bf16.msra.mxu1 %v2942_v27 }
 0x137   :  { %2502 = vmatprep.subr.bf16.mxu0 %v2943_v28  ;;  %2524 = vmatprep.subr.bf16.mxu1 %v2944_v29 }
 0x13a   :  { %2503 = vmatpush3.bf16.msra.mxu0 %v2945_v30  ;;  %2525 = vmatpush3.bf16.msra.mxu1 %v2946_v31 }
 0x1f0   :  { %v1645_v43 = vpop.f32.mrb[0].mxu0  ;;  %v1817_v44 = vpop.f32.mrb[0].mxu1 }
 0x1f1   :  { %v2532_v45 = vadd.f32 %v1645_v43, %v318_v39  ;;  %v2536_v46 = vadd.f32 %v1817_v44, %v326_v40  ;;  %v1647_v47 = vpop.f32.mrb[1].mxu0  ;;  %v1819_v48 = vpop.f32.mrb[1].mxu1 }
 0x1f2   :  { %v2533_v49 = vadd.f32 %v1647_v47, %v322_v41  ;;  %v2537_v50 = vadd.f32 %v1819_v48, %v330_v42  ;;  %v1649_v51 = vpop.f32.mrb[2].mxu0  ;;  %v1821_v52 = vpop.f32.mrb[2].mxu1 }
 0x1f3   :  { %v2534_v53 = vadd.f32 %v1649_v51, %v318_v39  ;;  %v2538_v54 = vadd.f32 %v1821_v52, %v326_v40  ;;  %v1651_v55 = vpop.f32.mrb[3].mxu0  ;;  %v1823_v56 = vpop.f32.mrb[3].mxu1  ;;  %v1826_v59 = vmax.f32 %v2532_v45, 0.0  ;;  %v1828_v60 = vmax.f32 %v2536_v46, 0.0 }
 0x1f4   :  { %v2535_v57 = vadd.f32 %v1651_v55, %v322_v41  ;;  %v2539_v58 = vadd.f32 %v1823_v56, %v330_v42  ;;  %v1827_v63 = vmax.f32 %v2533_v49, 0.0  ;;  %v1829_v0 = vmax.f32 %v2537_v50, 0.0 }
 0x1f5   :  { %v1830_v61 = vmax.f32 %v2534_v53, 0.0  ;;  %v1832_v62 = vmax.f32 %v2538_v54, 0.0 }
 0x1f6   :  { %v1831_v1 = vmax.f32 %v2535_v57, 0.0  ;;  %v1833_v2 = vmax.f32 %v2539_v58, 0.0 }
 0x1f7   :  { %v1834_v3 = vpack.c.bf16 %v1830_v61, %v1826_v59  ;;  %v1836_v4 = vpack.c.bf16 %v1832_v62, %v1828_v60 }
 0x1f8   :  { %v1835_v5 = vpack.c.bf16 %v1831_v1, %v1827_v63  ;;  %v1837_v6 = vpack.c.bf16 %v1833_v2, %v1829_v0 }
 0x1fa   :  { %2133 = vmatprep.mubr.bf16.mxu0 %v1835_v5  ;;  %2174 = vmatprep.mubr.bf16.mxu1 %v1837_v6 }
 0x1fb   :  { %2134 = vmatmul.mubr.bf16.vlgmr.msra.gmra.mrb[4].mxu0 %v1834_v3  ;;  %2175 = vmatmul.mubr.bf16.vlgmr.msra.gmra.mrb[4].mxu1 %v1836_v4 }
 0x2ce   :  { %v2504_v7 = vpop.f32.mrb[4].mxu0  ;;  %v2526_v8 = vpop.f32.mrb[4].mxu1 }
 0x2cf   :  { %v2505_v10 = vpop.f32.mrb[5].mxu0  ;;  %v2527_v11 = vpop.f32.mrb[5].mxu1 }
 0x2d0   :  { %v2506_v12 = vadd.f32 %v2505_v10, %v2504_v7  ;;  %v2528_v13 = vadd.f32 %v2527_v11, %v2526_v8  ;;  %v2507_v14 = vpop.f32.mrb[6].mxu0  ;;  %v2529_v15 = vpop.f32.mrb[6].mxu1 }
 0x2d1   :  { %v2508_v16 = vpop.f32.mrb[7].mxu0  ;;  %v2530_v17 = vpop.f32.mrb[7].mxu1 }
 0x2d2   :  { %v2136_v18 = vadd.f32 %v2506_v12, %v2455_v9  ;;  %v2509_v19 = vadd.f32 %v2508_v16, %v2507_v14  ;;  %v2531_v20 = vadd.f32 %v2530_v17, %v2529_v15 }
 0x2d4   :  { %v2139_v21 = vadd.f32 %v2509_v19, %v2455_v9  ;;  %v2177_v22 = vadd.f32 %v2528_v13, %v2136_v18 }
 0x2d6   :  { %2183 = vmax.xlane.f32.xlu0 %v2177_v22  ;;  %v2180_v23 = vadd.f32 %v2531_v20, %v2139_v21 }
 0x2da   :  { %2185 = vmax.xlane.f32.xlu0 %v2180_v23 }
 0x363   :  { %v2184_v24 = vpop.xlane.xlu0 %2183 }
 0x364   :  { %v2187_v25 = vsub.f32 %v2177_v22, %v2184_v24 }
 0x366   :  { %v2189_v26 = vmul.f32 1.442695, %v2187_v25 }
 0x367   :  { %v2186_v27 = vpop.xlane.xlu0 %2185 }
 0x368   :  { %v2188_v28 = vsub.f32 %v2180_v23, %v2186_v27  ;;  %2947 = vpow2.f32 %v2189_v26 }
 0x36a   :  { %v2191_v29 = vmul.f32 1.442695, %v2188_v28 }
 0x36c   :  { %2949 = vpow2.f32 %v2191_v29 }
 0x372   :  { %v2948_v30 = vpop.eup %2947 }
 0x373   :  { %2193 = vadd.xlane.f32.xlu1 %v2948_v30 }
 0x376   :  { %v2950_v31 = vpop.eup %2949 }
 0x377   :  { %2195 = vadd.xlane.f32.xlu1 %v2950_v31 }
 0x400   :  { %v2194_v32 = vpop.xlane.xlu1 %2193 }
 0x401   :  { %2951 = vlog2.f32 %v2194_v32 }
 0x404   :  { %v2196_v33 = vpop.xlane.xlu1 %2195 }
 0x405   :  { %2953 = vlog2.f32 %v2196_v33 }
 0x40b   :  { %v2952_v34 = vpop.eup %2951 }
 0x40c   :  { %v2198_v35 = vmul.f32 0.6931472, %v2952_v34 }
 0x40e   :  { %v2201_v36 = vsub.f32 %v2187_v25, %v2198_v35 }
 0x40f   :  { %v2954_v37 = vpop.eup %2953 }
 0x410   :  { %2203 = vst [vmem:[#allocation8] sm:$0xff] %v2201_v36  ;;  %v2200_v38 = vmul.f32 0.6931472, %v2954_v37 }
 0x412   :  { %v2202_v39 = vsub.f32 %v2188_v28, %v2200_v38 }
 0x414   :  { %2204 = vst [vmem:[#allocation8 + $0x8] sm:$0xff] %v2202_v39 }
 0x415   :  { %3032 = shalt.err (!%p3029_p0)
}
 0x416   :  { %s3033_s13 = scalar_lea.hbm %s3149_s5, 256 }
 0x417   :  { %p3034_p1 = scmp.ne.s32.totalorder %s3149_s5, %s3033_s13  ;;  %p3037_p2 = scmp.lt.u32.totalorder %s3033_s13, %s3149_s5 }
 0x419   :  { %p3039_p3 = pnand %p3037_p2, %p3034_p1 }
 0x41b   :  { %3042 = shalt.err (!%p3039_p3)
}
 0x41c   :  { %s3058_s17 = smov 128   ;;  %s3059_s18 = smov 8  }
 0x41d   :  { %2216 = dma.vmem_to_hbm [thread:$0]  %s2211_s9, 256, %s3149_s5, [#allocation4], %s3058_s17, %s3058_s17, %s3059_s18  }
 0x41e   :  { %3047 = dma.done.wait [#allocation4], 256  }
 0x41f   :  { %3048 = vsyncadd [#allocation4], 4294967040 }
 0x420   :  { %2220 = vsyncpa [#allocation3], 1 }
 0x421   :  { %2221 = vsyncpa [#allocation6], 1 }
 0x422   :  { %2222 = vsyncpa [#allocation4], 1 }

</bundles_post_ra>
